<compile_context>
chip_gen: v6e
topology: v6e:2x2x1
jax: 0.10.0
libtpu: 0.0.40
codegen_flags: <defaults>
</compile_context>

<pallas_src>
import jax
import jax.numpy as jnp
from jax.experimental import pallas as pl
from jax.experimental.pallas import tpu as pltpu


def _discriminator_kernel(x_ref, w1_ref, b1_ref, w2_ref, b2_ref,
                          w3_ref, b3_ref, o_ref):
    # In-kernel f32 -> bf16 cast (no separate XLA convert pass over HBM).
    x = x_ref[...].astype(jnp.bfloat16)                        # (TB, 784)

    # ---- Linear(784, 512) + LeakyReLU(0.2) ----  (bf16 MXU, f32 accumulate)
    h1 = jnp.dot(x, w1_ref[...], preferred_element_type=jnp.float32)
    h1 = h1 + b1_ref[...]                                      # (TB, 512) f32
    h1 = jnp.where(h1 >= 0.0, h1, 0.2 * h1)

    # ---- Linear(512, 256) + LeakyReLU(0.2) ----
    h2 = jnp.dot(h1.astype(jnp.bfloat16), w2_ref[...],
                 preferred_element_type=jnp.float32)
    h2 = h2 + b2_ref[...]                                      # (TB, 256) f32
    h2 = jnp.where(h2 >= 0.0, h2, 0.2 * h2)

    # ---- Linear(256, 1) + Sigmoid ----
    # N=1 matmul would use a single MXU output lane; do it on the VPU/XLU
    # instead: per-row multiply by w3 (stored as (1,256) f32) and reduce.
    h3 = jnp.sum(h2 * w3_ref[...], axis=-1, keepdims=True) + b3_ref[...]
    o_ref[...] = jax.nn.sigmoid(h3).astype(o_ref.dtype)        # (TB, 1)


def _pick_batch_tile(B):
    """Pick the batch tile (rows per grid step).

    * Tiny batches: one step over the whole batch.
    * Moderate batches (<= 2 * target): split into (at least) two
      sublane-aligned tiles so v7x's two TensorCores both get work via
      dimension_semantics=("parallel",).
    * Large batches: cap at `target` rows/step so per-step MXU work dwarfs
      the ~0.35 us grid-step overhead while the x double-buffer stays small
      (f32 x tile at TB=1024 is ~3.7 MB).
    """
    target = 1024
    if B <= 16:
        return B
    if B <= 2 * target:
        half = -(-B // 2)                      # ceil(B / 2)
        return ((half + 7) // 8) * 8           # round up to sublane multiple
    return target


def discriminator_forward(x, params):
    """x: (B, 784) float32 -> (B, 1) float32."""
    w1, b1, w2, b2, w3t, b3 = params
    B, F = x.shape

    TB = _pick_batch_tile(B)
    grid = (pl.cdiv(B, TB),)

    # Weights stay resident: constant index_map -> DMA'd once, reused across
    # all grid steps; single-buffered (no point double-buffering constants).
    def const_spec(a):
        return pl.BlockSpec(a.shape, lambda i: (0,) * a.ndim,
                            pipeline_mode=pl.Buffered(1))

    return pl.pallas_call(
        _discriminator_kernel,
        out_shape=jax.ShapeDtypeStruct((B, 1), jnp.float32),
        grid_spec=pltpu.PrefetchScalarGridSpec(
            num_scalar_prefetch=0,
            grid=grid,
            in_specs=[pl.BlockSpec((TB, F), lambda i: (i, 0)),   # x tile (f32)
                      const_spec(w1), const_spec(b1),
                      const_spec(w2), const_spec(b2),
                      const_spec(w3t), const_spec(b3)],
            out_specs=pl.BlockSpec((TB, 1), lambda i: (i, 0)),
        ),
        compiler_params=pltpu.CompilerParams(
            dimension_semantics=("parallel",),     # shard batch tiles over TCs
            vmem_limit_bytes=32 << 20,             # ~10 MB actual at TB=1024
        ),
    )(x, w1, b1, w2, b2, w3t, b3)


def init_params(key):
    """Deterministic params mimicking nn.Linear default init
    U(-1/sqrt(fan_in), 1/sqrt(fan_in)).

    Storage layout for the kernel:
      w1: (784, 512) bf16   b1: (1, 512) f32
      w2: (512, 256) bf16   b2: (1, 256) f32
      w3t: (1, 256)  f32    b3: (1, 1)   f32   (layer-3 weight transposed)
    """
    dims = [(784, 512), (512, 256), (256, 1)]
    raw = []
    for (fan_in, fan_out) in dims:
        key, kw, kb = jax.random.split(key, 3)
        bound = 1.0 / (fan_in ** 0.5)
        w = jax.random.uniform(kw, (fan_in, fan_out), jnp.float32,
                               minval=-bound, maxval=bound)
        b = jax.random.uniform(kb, (1, fan_out), jnp.float32,
                               minval=-bound, maxval=bound)
        raw += [w, b]
    w1, b1, w2, b2, w3, b3 = raw
    return (w1.astype(jnp.bfloat16), b1,
            w2.astype(jnp.bfloat16), b2,
            w3.T, b3)                       # w3 stored as (1, 256) f32


def reference_forward(x, params):
    """Pure-JAX reference mirroring the kernel's precision choices."""
    w1, b1, w2, b2, w3t, b3 = params
    xb = x.astype(jnp.bfloat16)
    h1 = jnp.dot(xb, w1, preferred_element_type=jnp.float32) + b1
    h1 = jnp.where(h1 >= 0.0, h1, 0.2 * h1)
    h2 = jnp.dot(h1.astype(jnp.bfloat16), w2,
                 preferred_element_type=jnp.float32) + b2
    h2 = jnp.where(h2 >= 0.0, h2, 0.2 * h2)
    h3 = jnp.sum(h2 * w3t, axis=-1, keepdims=True) + b3
    return jax.nn.sigmoid(h3)


if __name__ == "__main__":
    key = jax.random.PRNGKey(0)
    params = init_params(key)

    # Small single-step batch.
    key, kx = jax.random.split(key)
    B = 8
    x = jax.random.normal(kx, (B, 784), dtype=jnp.float32)
    out = jax.block_until_ready(discriminator_forward(x, params))
    ref = reference_forward(x, params)
    assert out.shape == (B, 1), out.shape
    assert jnp.allclose(out, ref, atol=2e-3, rtol=2e-3), \
        f"max abs err {jnp.max(jnp.abs(out - ref))}"

    # Batch that exercises a multi-step grid (2 tiles, last tile clipped).
    key, kx2 = jax.random.split(key)
    B2 = 40
    x2 = jax.random.normal(kx2, (B2, 784), dtype=jnp.float32)
    out2 = jax.block_until_ready(discriminator_forward(x2, params))
    ref2 = reference_forward(x2, params)
    assert out2.shape == (B2, 1), out2.shape
    assert jnp.allclose(out2, ref2, atol=2e-3, rtol=2e-3), \
        f"max abs err {jnp.max(jnp.abs(out2 - ref2))}"

    print("KERNEL_OK")
</pallas_src>

<mosaic_0001>
module attributes {stable_mosaic.version = 11 : i64} {
  func.func @_discriminator_kernel(%arg0: i32, %arg1: memref<8x784xf32, #tpu.memory_space<vmem>>, %arg2: memref<784x512xbf16, #tpu.memory_space<vmem>>, %arg3: memref<1x512xf32, #tpu.memory_space<vmem>>, %arg4: memref<512x256xbf16, #tpu.memory_space<vmem>>, %arg5: memref<1x256xf32, #tpu.memory_space<vmem>>, %arg6: memref<1x256xf32, #tpu.memory_space<vmem>>, %arg7: memref<1x1xf32, #tpu.memory_space<vmem>>, %arg8: memref<8x1xf32, #tpu.memory_space<vmem>>) attributes {dimension_semantics = [#tpu.dimension_semantics<parallel>], iteration_bounds = array<i64: 1>, scalar_prefetch = 0 : i64, scratch_operands = 0 : i64, tpu.core_type = #tpu.core_type<tc>, window_params = [{transform_indices = @transform_0, window_bounds = array<i64: 8, 784>}, {pipeline_mode = #tpu.pipeline_mode<synchronous>, transform_indices = @transform_1, window_bounds = array<i64: 784, 512>}, {pipeline_mode = #tpu.pipeline_mode<synchronous>, transform_indices = @transform_2, window_bounds = array<i64: 1, 512>}, {pipeline_mode = #tpu.pipeline_mode<synchronous>, transform_indices = @transform_3, window_bounds = array<i64: 512, 256>}, {pipeline_mode = #tpu.pipeline_mode<synchronous>, transform_indices = @transform_4, window_bounds = array<i64: 1, 256>}, {pipeline_mode = #tpu.pipeline_mode<synchronous>, transform_indices = @transform_5, window_bounds = array<i64: 1, 256>}, {pipeline_mode = #tpu.pipeline_mode<synchronous>, transform_indices = @transform_6, window_bounds = array<i64: 1, 1>}, {transform_indices = @transform_7, window_bounds = array<i64: 8, 1>}]} {
    %c0 = arith.constant 0 : index
    %c0_0 = arith.constant 0 : index
    %0 = vector.load %arg1[%c0, %c0_0] : memref<8x784xf32, #tpu.memory_space<vmem>>, vector<8x784xf32>
    %1 = arith.truncf %0 : vector<8x784xf32> to vector<8x784xbf16>
    %c0_1 = arith.constant 0 : index
    %c0_2 = arith.constant 0 : index
    %2 = vector.load %arg2[%c0_1, %c0_2] : memref<784x512xbf16, #tpu.memory_space<vmem>>, vector<784x512xbf16>
    %cst = arith.constant dense<0.000000e+00> : vector<8x512xf32>
    %3 = tpu.matmul %1, %2, %cst {dimension_numbers = #tpu.dot_dimension_numbers<[1], [0], [0], [1], [0, 0, 1, 1], [], []>} : vector<8x784xbf16>, vector<784x512xbf16>, vector<8x512xf32> -> vector<8x512xf32>
    %c0_3 = arith.constant 0 : index
    %c0_4 = arith.constant 0 : index
    %4 = vector.load %arg3[%c0_3, %c0_4] : memref<1x512xf32, #tpu.memory_space<vmem>>, vector<1x512xf32>
    %5 = vector.broadcast %4 : vector<1x512xf32> to vector<8x512xf32>
    %6 = arith.addf %3, %5 : vector<8x512xf32>
    %cst_5 = arith.constant 0.000000e+00 : f32
    %7 = vector.broadcast %cst_5 : f32 to vector<8x512xf32>
    %8 = arith.cmpf oge, %6, %7 : vector<8x512xf32>
    %cst_6 = arith.constant 2.000000e-01 : f32
    %9 = vector.broadcast %cst_6 : f32 to vector<8x512xf32>
    %10 = arith.mulf %9, %6 : vector<8x512xf32>
    %11 = arith.select %8, %6, %10 : vector<8x512xi1>, vector<8x512xf32>
    %12 = arith.truncf %11 : vector<8x512xf32> to vector<8x512xbf16>
    %c0_7 = arith.constant 0 : index
    %c0_8 = arith.constant 0 : index
    %13 = vector.load %arg4[%c0_7, %c0_8] : memref<512x256xbf16, #tpu.memory_space<vmem>>, vector<512x256xbf16>
    %cst_9 = arith.constant dense<0.000000e+00> : vector<8x256xf32>
    %14 = tpu.matmul %12, %13, %cst_9 {dimension_numbers = #tpu.dot_dimension_numbers<[1], [0], [0], [1], [0, 0, 1, 1], [], []>} : vector<8x512xbf16>, vector<512x256xbf16>, vector<8x256xf32> -> vector<8x256xf32>
    %c0_10 = arith.constant 0 : index
    %c0_11 = arith.constant 0 : index
    %15 = vector.load %arg5[%c0_10, %c0_11] : memref<1x256xf32, #tpu.memory_space<vmem>>, vector<1x256xf32>
    %16 = vector.broadcast %15 : vector<1x256xf32> to vector<8x256xf32>
    %17 = arith.addf %14, %16 : vector<8x256xf32>
    %cst_12 = arith.constant 0.000000e+00 : f32
    %18 = vector.broadcast %cst_12 : f32 to vector<8x256xf32>
    %19 = arith.cmpf oge, %17, %18 : vector<8x256xf32>
    %cst_13 = arith.constant 2.000000e-01 : f32
    %20 = vector.broadcast %cst_13 : f32 to vector<8x256xf32>
    %21 = arith.mulf %20, %17 : vector<8x256xf32>
    %22 = arith.select %19, %17, %21 : vector<8x256xi1>, vector<8x256xf32>
    %c0_14 = arith.constant 0 : index
    %c0_15 = arith.constant 0 : index
    %23 = vector.load %arg6[%c0_14, %c0_15] : memref<1x256xf32, #tpu.memory_space<vmem>>, vector<1x256xf32>
    %24 = vector.broadcast %23 : vector<1x256xf32> to vector<8x256xf32>
    %25 = arith.mulf %22, %24 : vector<8x256xf32>
    %cst_16 = arith.constant dense<0.000000e+00> : vector<8xf32>
    %26 = vector.multi_reduction <add>, %25, %cst_16 [1] : vector<8x256xf32> to vector<8xf32>
    %27 = vector.shape_cast %26 : vector<8xf32> to vector<8x1xf32>
    %c0_17 = arith.constant 0 : index
    %c0_18 = arith.constant 0 : index
    %28 = vector.load %arg7[%c0_17, %c0_18] : memref<1x1xf32, #tpu.memory_space<vmem>>, vector<1x1xf32>
    %29 = vector.broadcast %28 : vector<1x1xf32> to vector<8x1xf32>
    %30 = arith.addf %27, %29 : vector<8x1xf32>
    %31 = arith.negf %30 : vector<8x1xf32>
    %32 = math.exp %31 : vector<8x1xf32>
    %cst_19 = arith.constant 1.000000e+00 : f32
    %33 = vector.broadcast %cst_19 : f32 to vector<8x1xf32>
    %34 = arith.addf %33, %32 : vector<8x1xf32>
    %35 = arith.divf %33, %34 : vector<8x1xf32>
    %c0_20 = arith.constant 0 : index
    %c0_21 = arith.constant 0 : index
    %36 = vector.load %arg8[%c0_20, %c0_21] : memref<8x1xf32, #tpu.memory_space<vmem>>, vector<8x1xf32>
    tpu.vector_store %arg8[%c0_20, %c0_21], %35 {strides = array<i32>} : memref<8x1xf32, #tpu.memory_space<vmem>>, vector<8x1xf32>,
    return
  }
  func.func @transform_0(%arg0: i32) -> (i32, i32) {
    %c0_i32 = arith.constant 0 : i32
    %c0_i32_0 = arith.constant 0 : i32
    return %arg0, %c0_i32 : i32, i32
  }
  func.func @transform_1(%arg0: i32) -> (i32, i32) {
    %c0_i32 = arith.constant 0 : i32
    %c0_i32_0 = arith.constant 0 : i32
    %c0_i32_1 = arith.constant 0 : i32
    return %c0_i32, %c0_i32_0 : i32, i32
  }
  func.func @transform_2(%arg0: i32) -> (i32, i32) {
    %c0_i32 = arith.constant 0 : i32
    %c0_i32_0 = arith.constant 0 : i32
    %c0_i32_1 = arith.constant 0 : i32
    return %c0_i32, %c0_i32_0 : i32, i32
  }
  func.func @transform_3(%arg0: i32) -> (i32, i32) {
    %c0_i32 = arith.constant 0 : i32
    %c0_i32_0 = arith.constant 0 : i32
    %c0_i32_1 = arith.constant 0 : i32
    return %c0_i32, %c0_i32_0 : i32, i32
  }
  func.func @transform_4(%arg0: i32) -> (i32, i32) {
    %c0_i32 = arith.constant 0 : i32
    %c0_i32_0 = arith.constant 0 : i32
    %c0_i32_1 = arith.constant 0 : i32
    return %c0_i32, %c0_i32_0 : i32, i32
  }
  func.func @transform_5(%arg0: i32) -> (i32, i32) {
    %c0_i32 = arith.constant 0 : i32
    %c0_i32_0 = arith.constant 0 : i32
    %c0_i32_1 = arith.constant 0 : i32
    return %c0_i32, %c0_i32_0 : i32, i32
  }
  func.func @transform_6(%arg0: i32) -> (i32, i32) {
    %c0_i32 = arith.constant 0 : i32
    %c0_i32_0 = arith.constant 0 : i32
    %c0_i32_1 = arith.constant 0 : i32
    return %c0_i32, %c0_i32_0 : i32, i32
  }
  func.func @transform_7(%arg0: i32) -> (i32, i32) {
    %c0_i32 = arith.constant 0 : i32
    %c0_i32_0 = arith.constant 0 : i32
    return %arg0, %c0_i32 : i32, i32
  }
}

</mosaic_0001>

<bundles_post_ra>
// kernel: tpu_custom_call.1
= control target key start
LH: loop header
LB: loop body
LE: loop exit
PB: predicated region body
PF: predicated region fallthrough
CT: control target
= control target key end

     0   :  { %s2995_s0 = inlined_call_operand.hbm [shape: f32[8,784], index: 0, kind: input, shape index: {}]   ;;  %s2996_s1 = inlined_call_operand.hbm [shape: bf16[784,512], index: 1, kind: input, shape index: {}]   ;;  %s2997_s2 = inlined_call_operand.vmem [shape: f32[1,512], index: 2, kind: input, shape index: {}]   ;;  %s2998_s3 = inlined_call_operand.hbm [shape: bf16[512,256], index: 3, kind: input, shape index: {}]   ;;  %s2999_s4 = inlined_call_operand.vmem [shape: f32[1,256], index: 4, kind: input, shape index: {}]   ;;  %s3000_s5 = inlined_call_operand.vmem [shape: f32[1,256], index: 5, kind: input, shape index: {}]   ;;  %s3001_s6 = inlined_call_operand.<no memory space> [shape: f32[1,1], index: 6, kind: input, shape index: {}]   ;;  %s3002_s7 = inlined_call_operand.vmem [shape: f32[8,1], index: 7, kind: output, shape index: {}]  }
   0x1   :  { %v12_v0 = vstv %s3001_s6 }
   0x2   :  { %13 = vst [vmem:[#allocation2] sm:$0x1] %v12_v0 }
   0x3   :  { %14 = vsyncpa [#allocation4], 0 }
   0x4   :  { %15 = vsyncpa [#allocation6], 0  ;;  %s2881_s26 = smov [#allocation5]  }
   0x5   :  { %s31_s27 = sshll.u32 %s2881_s26, 4  ;;  %s32_s27 = int_to_ptr.vmem [resolvable:$true] %s31_s27 }
   0x6   :  { %s2825_s28 = scalar_lea.vmem %s32_s27, 25088  ;;  %p2830_p1 = scmp.lt.s32.totalorder %s32_s27, %s32_s27 }
   0x7   :  { %p2826_p0 = scmp.ne.s32.totalorder %s32_s27, %s2825_s28  ;;  %p2831_p2 = scmp.lt.s32.totalorder %s2825_s28, %s2825_s28 }
   0x9   :  { %p2832_p3 = por %p2831_p2, %p2830_p1 }
   0xb   :  { %p2833_p4 = pnand %p2832_p3, %p2826_p0 }
   0xd   :  { %2836 = shalt.err (!%p2833_p4)
}
   0xe   :  { %s2882_s29 = smov 256   ;;  %s2883_s30 = smov 16  }
   0xf   :  { %37 = dma.hbm_to_vmem [thread:$0]  %s2996_s1, 25088, %s32_s27, [#allocation6], %s2882_s29, %s2882_s29, %s2883_s30  }
  0x10   :  { %s2884_s6 = smov [#allocation3]   ;;  %s2885_s11 = smov [#allocation7]  }
  0x11   :  { %s22_s10 = sshll.u32 %s2884_s6, 4  ;;  %s45_s12 = sshll.u32 %s2885_s11, 4  ;;  %s23_s10 = int_to_ptr.vmem [resolvable:$true] %s22_s10  ;;  %s46_s12 = int_to_ptr.vmem [resolvable:$true] %s45_s12 }
  0x12   :  { %s2845_s13 = scalar_lea.vmem %s23_s10, 896  ;;  %p2850_p6 = scmp.lt.s32.totalorder %s23_s10, %s23_s10 }
  0x13   :  { %p2846_p5 = scmp.ne.s32.totalorder %s23_s10, %s2845_s13  ;;  %p2851_p7 = scmp.lt.s32.totalorder %s2845_s13, %s2845_s13 }
  0x15   :  { %p2852_p8 = por %p2851_p7, %p2850_p6 }
  0x17   :  { %p2853_p9 = pnand %p2852_p8, %p2846_p5 }
  0x19   :  { %2856 = shalt.err (!%p2853_p9)
}
  0x1a   :  { %25 = dma.hbm_to_vmem [thread:$0]  %s2995_s0, 896, %s23_s10, [#allocation4]  }
  0x1b   :  { %s2865_s16 = scalar_lea.vmem %s46_s12, 8192  ;;  %p2870_p11 = scmp.lt.s32.totalorder %s46_s12, %s46_s12 }
  0x1c   :  { %p2866_p10 = scmp.ne.s32.totalorder %s46_s12, %s2865_s16  ;;  %p2871_p12 = scmp.lt.s32.totalorder %s2865_s16, %s2865_s16 }
  0x1e   :  { %p2872_p13 = por %p2871_p12, %p2870_p11 }
  0x20   :  { %p2873_p0 = pnand %p2872_p13, %p2866_p10 }
  0x22   :  { %2876 = shalt.err (!%p2873_p0)
}
  0x23   :  { %s2886_s1 = smov 128   ;;  %s2887_s17 = smov 8  }
  0x24   :  { %51 = dma.hbm_to_vmem [thread:$0]  %s2998_s3, 8192, %s46_s12, [#allocation6], %s2886_s1, %s2886_s1, %s2887_s17  }
  0x25   :  { %2877 = dma.done.wait [#allocation4], 896  }
  0x26   :  { %2878 = vsyncadd [#allocation4], 4294966400 }
  0x27   :  { %2879 = dma.done.wait [#allocation6], 33280  }
  0x28   :  { %2880 = vsyncadd [#allocation6], 4294934016  ;;  %v2423_v1 = vld [vmem:[#allocation5 + $0xe4] ss:$16 sps:$4 sm:$0xff]   ;;  %v2427_v3 = vld [vmem:[#allocation5 + $0xe0] ss:$16 sps:$4 sm:$0xff]  }
  0x29   :  { %v2425_v2 = vld [vmem:[#allocation5 + $0x2e4] ss:$16 sps:$4 sm:$0xff]   ;;  %1284 = vmatprep.subr.bf16.mxu0 %v2423_v1  ;;  %v2428_v4 = vld [vmem:[#allocation5 + $0x2e0] ss:$16 sps:$4 sm:$0xff]   ;;  %vm1280_vm0 = vcmask 130048   ;;  %vm2143_vm7 = vcmask 7168  }
  0x2a   :  { %1325 = vmatprep.subr.bf16.mxu1 %v2425_v2  ;;  %v2429_v5 = vld [vmem:[#allocation5 + $0xc4] ss:$16 sps:$4 sm:$0xff]   ;;  %1285 = vmatpush1.bf16.msra.mxu0 %v2427_v3  ;;  %v2433_v7 = vld [vmem:[#allocation5 + $0xc0] ss:$16 sps:$4 sm:$0xff]  }
  0x2b   :  { %1326 = vmatpush1.bf16.msra.mxu1 %v2428_v4  ;;  %v2431_v6 = vld [vmem:[#allocation5 + $0x2c4] ss:$16 sps:$4 sm:$0xff]   ;;  %1286 = vmatprep.subr.bf16.mxu0 %v2429_v5  ;;  %v2434_v8 = vld [vmem:[#allocation5 + $0x2c0] ss:$16 sps:$4 sm:$0xff]   ;;  %v68_v5 = vld [vmem:[#allocation3] sm:$0xff] }
  0x2c   :  { %1327 = vmatprep.subr.bf16.mxu1 %v2431_v6  ;;  %v2435_v9 = vld [vmem:[#allocation5 + $0xa4] ss:$16 sps:$4 sm:$0xff]   ;;  %v2439_v11 = vld [vmem:[#allocation5 + $0xa0] ss:$16 sps:$4 sm:$0xff]   ;;  %v70_v6 = vld [vmem:[#allocation3 + $0x10] sm:$0xff] }
  0x2d   :  { %v2437_v10 = vld [vmem:[#allocation5 + $0x2a4] ss:$16 sps:$4 sm:$0xff]   ;;  %v2440_v12 = vld [vmem:[#allocation5 + $0x2a0] ss:$16 sps:$4 sm:$0xff]  }
  0x2e   :  { %1287 = vmatpush1.bf16.msra.mxu0 %v2433_v7  ;;  %v2441_v13 = vld [vmem:[#allocation5 + $0x84] ss:$16 sps:$4 sm:$0xff]   ;;  %v2445_v15 = vld [vmem:[#allocation5 + $0x80] ss:$16 sps:$4 sm:$0xff]  }
  0x2f   :  { %1328 = vmatpush1.bf16.msra.mxu1 %v2434_v8  ;;  %1288 = vmatprep.subr.bf16.mxu0 %v2435_v9  ;;  %v2443_v14 = vld [vmem:[#allocation5 + $0x284] ss:$16 sps:$4 sm:$0xff]   ;;  %v2446_v16 = vld [vmem:[#allocation5 + $0x280] ss:$16 sps:$4 sm:$0xff]   ;;  %v2947_v9 = vpack.c.bf16 %v68_v5, %v68_v5  ;;  %v2602_v5 = vld [vmem:[#allocation5 + $0x16c] ss:$16 sps:$4 sm:$0xff]  }
  0x30   :  { %1329 = vmatprep.subr.bf16.mxu1 %v2437_v10  ;;  %v2447_v17 = vld [vmem:[#allocation5 + $0x64] ss:$16 sps:$4 sm:$0xff]   ;;  %v2451_v19 = vld [vmem:[#allocation5 + $0x60] ss:$16 sps:$4 sm:$0xff]   ;;  %v2949_v10 = vpack.c.bf16 %v70_v6, %v70_v6 }
  0x31   :  { %v2449_v18 = vld [vmem:[#allocation5 + $0x264] ss:$16 sps:$4 sm:$0xff]   ;;  %v2452_v20 = vld [vmem:[#allocation5 + $0x260] ss:$16 sps:$4 sm:$0xff]  }
  0x32   :  { %1289 = vmatpush1.bf16.msra.mxu0 %v2439_v11  ;;  %v2453_v21 = vld [vmem:[#allocation5 + $0x44] ss:$16 sps:$4 sm:$0xff]   ;;  %v2457_v23 = vld [vmem:[#allocation5 + $0x40] ss:$16 sps:$4 sm:$0xff]  }
  0x33   :  { %1330 = vmatpush1.bf16.msra.mxu1 %v2440_v12  ;;  %1290 = vmatprep.subr.bf16.mxu0 %v2441_v13  ;;  %v2455_v22 = vld [vmem:[#allocation5 + $0x244] ss:$16 sps:$4 sm:$0xff]   ;;  %v2458_v24 = vld [vmem:[#allocation5 + $0x240] ss:$16 sps:$4 sm:$0xff]  }
  0x34   :  { %1331 = vmatprep.subr.bf16.mxu1 %v2443_v14  ;;  %v2459_v25 = vld [vmem:[#allocation5 + $0x24] ss:$16 sps:$4 sm:$0xff]   ;;  %v2463_v27 = vld [vmem:[#allocation5 + $0x20] ss:$16 sps:$4 sm:$0xff]   ;;  %v2530_v14 = vld [vmem:[#allocation5 + $0xec] ss:$16 sps:$4 sm:$0xff]  }
  0x35   :  { %v2461_v26 = vld [vmem:[#allocation5 + $0x224] ss:$16 sps:$4 sm:$0xff]   ;;  %v2464_v28 = vld [vmem:[#allocation5 + $0x220] ss:$16 sps:$4 sm:$0xff]  }
  0x36   :  { %1291 = vmatpush1.bf16.msra.mxu0 %v2445_v15  ;;  %v2465_v29 = vld [vmem:[#allocation5 + $0x4] ss:$16 sps:$4 sm:$0xff]   ;;  %v2469_v31 = vld [vmem:[#allocation5] ss:$16 sps:$4 sm:$0xff]  }
  0x37   :  { %1332 = vmatpush1.bf16.msra.mxu1 %v2446_v16  ;;  %1292 = vmatprep.subr.bf16.mxu0 %v2447_v17  ;;  %v2467_v30 = vld [vmem:[#allocation5 + $0x204] ss:$16 sps:$4 sm:$0xff]   ;;  %v2470_v32 = vld [vmem:[#allocation5 + $0x200] ss:$16 sps:$4 sm:$0xff]   ;;  %v74_v16 = vld [vmem:[#allocation3 + $0x30] sm:$0xff]  ;;  %v2888_v17 = vmov 0  }
  0x38   :  { %1333 = vmatprep.subr.bf16.mxu1 %v2449_v18  ;;  %v2471_v33 = vld [vmem:[#allocation5 + $0x1e4] ss:$16 sps:$4 sm:$0xff]   ;;  %v2475_v35 = vld [vmem:[#allocation5 + $0x1e0] ss:$16 sps:$4 sm:$0xff]  }
  0x39   :  { %v2473_v34 = vld [vmem:[#allocation5 + $0x3e4] ss:$16 sps:$4 sm:$0xff]   ;;  %v2476_v36 = vld [vmem:[#allocation5 + $0x3e0] ss:$16 sps:$4 sm:$0xff]  }
  0x3a   :  { %1293 = vmatpush1.bf16.msra.mxu0 %v2451_v19  ;;  %v2477_v37 = vld [vmem:[#allocation5 + $0x1c4] ss:$16 sps:$4 sm:$0xff]   ;;  %v2481_v39 = vld [vmem:[#allocation5 + $0x1c0] ss:$16 sps:$4 sm:$0xff]   ;;  %v2528_v19 = vld [vmem:[#allocation5 + $0xe8] ss:$16 sps:$4 sm:$0xff]  }
  0x3b   :  { %1334 = vmatpush1.bf16.msra.mxu1 %v2452_v20  ;;  %1294 = vmatprep.subr.bf16.mxu0 %v2453_v21  ;;  %v2479_v38 = vld [vmem:[#allocation5 + $0x3c4] ss:$16 sps:$4 sm:$0xff]   ;;  %v2482_v40 = vld [vmem:[#allocation5 + $0x3c0] ss:$16 sps:$4 sm:$0xff]   ;;  %v2954_v20 = vpack.c.bf16 %v74_v16, %v74_v16  ;;  %v72_v16 = vld [vmem:[#allocation3 + $0x20] sm:$0xff] }
  0x3c   :  { %1335 = vmatprep.subr.bf16.mxu1 %v2455_v22  ;;  %v2483_v41 = vld [vmem:[#allocation5 + $0x1a4] ss:$16 sps:$4 sm:$0xff]   ;;  %v2487_v43 = vld [vmem:[#allocation5 + $0x1a0] ss:$16 sps:$4 sm:$0xff]   ;;  %v2536_v22 = vld [vmem:[#allocation5 + $0xcc] ss:$16 sps:$4 sm:$0xff]  }
  0x3d   :  { %v2485_v42 = vld [vmem:[#allocation5 + $0x3a4] ss:$16 sps:$4 sm:$0xff]   ;;  %v2488_v44 = vld [vmem:[#allocation5 + $0x3a0] ss:$16 sps:$4 sm:$0xff]  }
  0x3e   :  { %1295 = vmatpush1.bf16.msra.mxu0 %v2457_v23  ;;  %v2489_v45 = vld [vmem:[#allocation5 + $0x184] ss:$16 sps:$4 sm:$0xff]   ;;  %v2493_v48 = vld [vmem:[#allocation5 + $0x180] ss:$16 sps:$4 sm:$0xff]  }
  0x3f   :  { %1336 = vmatpush1.bf16.msra.mxu1 %v2458_v24  ;;  %1296 = vmatprep.subr.bf16.mxu0 %v2459_v25  ;;  %v2491_v46 = vld [vmem:[#allocation5 + $0x384] ss:$16 sps:$4 sm:$0xff]   ;;  %v2494_v49 = vld [vmem:[#allocation5 + $0x380] ss:$16 sps:$4 sm:$0xff]   ;;  %v2534_v24 = vld [vmem:[#allocation5 + $0xc8] ss:$16 sps:$4 sm:$0xff]  }
  0x40   :  { %1337 = vmatprep.subr.bf16.mxu1 %v2461_v26  ;;  %v69_v47 = vld [vmem:[#allocation3 + $0x8] sm:$0xff]  ;;  %v71_v51 = vld [vmem:[#allocation3 + $0x18] sm:$0xff]  ;;  %v2542_v26 = vld [vmem:[#allocation5 + $0xac] ss:$16 sps:$4 sm:$0xff]  }
  0x41   :  { %v2941_v50 = vpack.c.bf16 %v69_v47, %v69_v47  ;;  %v2495_v52 = vld [vmem:[#allocation5 + $0x164] ss:$16 sps:$4 sm:$0xff]   ;;  %v2943_v53 = vpack.c.bf16 %v71_v51, %v71_v51  ;;  %v2499_v55 = vld [vmem:[#allocation5 + $0x160] ss:$16 sps:$4 sm:$0xff]  }
  0x42   :  { %1297 = vmatpush1.bf16.msra.mxu0 %v2463_v27  ;;  %v2497_v54 = vld [vmem:[#allocation5 + $0x364] ss:$16 sps:$4 sm:$0xff]   ;;  %v2500_v56 = vld [vmem:[#allocation5 + $0x360] ss:$16 sps:$4 sm:$0xff]  }
  0x43   :  { %1338 = vmatpush1.bf16.msra.mxu1 %v2464_v28  ;;  %1298 = vmatprep.subr.bf16.mxu0 %v2465_v29  ;;  %v2501_v57 = vld [vmem:[#allocation5 + $0x144] ss:$16 sps:$4 sm:$0xff]   ;;  %v2505_v59 = vld [vmem:[#allocation5 + $0x140] ss:$16 sps:$4 sm:$0xff]   ;;  %v2540_v28 = vld [vmem:[#allocation5 + $0xa8] ss:$16 sps:$4 sm:$0xff]  }
  0x44   :  { %1339 = vmatprep.subr.bf16.mxu1 %v2467_v30  ;;  %1316 = vmatprep.mubr.bf16.mxu0 %v2941_v50  ;;  %v2503_v58 = vld [vmem:[#allocation5 + $0x344] ss:$16 sps:$4 sm:$0xff]   ;;  %v2506_v60 = vld [vmem:[#allocation5 + $0x340] ss:$16 sps:$4 sm:$0xff]   ;;  %v2548_v30 = vld [vmem:[#allocation5 + $0x8c] ss:$16 sps:$4 sm:$0xff]  }
  0x45   :  { %1357 = vmatprep.mubr.bf16.mxu1 %v2943_v53  ;;  %v2507_v61 = vld [vmem:[#allocation5 + $0x124] ss:$16 sps:$4 sm:$0xff]   ;;  %v2511_v63 = vld [vmem:[#allocation5 + $0x120] ss:$16 sps:$4 sm:$0xff]  }
  0x46   :  { %1299 = vmatpush1.bf16.msra.mxu0 %v2469_v31  ;;  %v2509_v62 = vld [vmem:[#allocation5 + $0x324] ss:$16 sps:$4 sm:$0xff]   ;;  %v2512_v0 = vld [vmem:[#allocation5 + $0x320] ss:$16 sps:$4 sm:$0xff]  }
  0x47   :  { %1340 = vmatpush1.bf16.msra.mxu1 %v2470_v32  ;;  %1300 = vmatprep.subr.bf16.mxu0 %v2471_v33  ;;  %v2513_v1 = vld [vmem:[#allocation5 + $0x104] ss:$16 sps:$4 sm:$0xff]   ;;  %v2517_v3 = vld [vmem:[#allocation5 + $0x100] ss:$16 sps:$4 sm:$0xff]   ;;  %v2546_v32 = vld [vmem:[#allocation5 + $0x88] ss:$16 sps:$4 sm:$0xff]  }
  0x48   :  { %1341 = vmatprep.subr.bf16.mxu1 %v2473_v34  ;;  %v2515_v2 = vld [vmem:[#allocation5 + $0x304] ss:$16 sps:$4 sm:$0xff]   ;;  %v2518_v4 = vld [vmem:[#allocation5 + $0x300] ss:$16 sps:$4 sm:$0xff]   ;;  %v2554_v34 = vld [vmem:[#allocation5 + $0x6c] ss:$16 sps:$4 sm:$0xff]  }
  0x49   :  { %v2521_v7 = vld [vmem:[#allocation5 + $0x4e4] ss:$16 sps:$4 sm:$0xff]   ;;  %v2519_v11 = vld [vmem:[#allocation5 + $0x4e0] ss:$16 sps:$4 sm:$0xff]  }
  0x4a   :  { %1301 = vmatpush2.bf16.msra.mxu0 %v2475_v35  ;;  %v2524_v8 = vld [vmem:[#allocation5 + $0x604] ss:$16 sps:$4 sm:$0xff]   ;;  %v2522_v12 = vld [vmem:[#allocation5 + $0x600] ss:$16 sps:$4 sm:$0xff]  }
  0x4b   :  { %1342 = vmatpush2.bf16.msra.mxu1 %v2476_v36  ;;  %1302 = vmatprep.subr.bf16.mxu0 %v2477_v37  ;;  %v2527_v13 = vld [vmem:[#allocation5 + $0x4c4] ss:$16 sps:$4 sm:$0xff]   ;;  %v2525_v15 = vld [vmem:[#allocation5 + $0x4c0] ss:$16 sps:$4 sm:$0xff]  }
  0x4c   :  { %1343 = vmatprep.subr.bf16.mxu1 %v2479_v38  ;;  %v2533_v18 = vld [vmem:[#allocation5 + $0x4a4] ss:$16 sps:$4 sm:$0xff]   ;;  %v2531_v21 = vld [vmem:[#allocation5 + $0x4a0] ss:$16 sps:$4 sm:$0xff]   ;;  %v2552_v38 = vld [vmem:[#allocation5 + $0x68] ss:$16 sps:$4 sm:$0xff]  }
  0x4d   :  { %v2539_v23 = vld [vmem:[#allocation5 + $0x484] ss:$16 sps:$4 sm:$0xff]   ;;  %v2537_v25 = vld [vmem:[#allocation5 + $0x480] ss:$16 sps:$4 sm:$0xff]  }
  0x4e   :  { %1303 = vmatpush2.bf16.msra.mxu0 %v2481_v39  ;;  %v2545_v27 = vld [vmem:[#allocation5 + $0x464] ss:$16 sps:$4 sm:$0xff]   ;;  %v2543_v29 = vld [vmem:[#allocation5 + $0x460] ss:$16 sps:$4 sm:$0xff]  }
  0x4f   :  { %1344 = vmatpush2.bf16.msra.mxu1 %v2482_v40  ;;  %1304 = vmatprep.subr.bf16.mxu0 %v2483_v41  ;;  %v2551_v31 = vld [vmem:[#allocation5 + $0x444] ss:$16 sps:$4 sm:$0xff]   ;;  %v2549_v33 = vld [vmem:[#allocation5 + $0x440] ss:$16 sps:$4 sm:$0xff]   ;;  %v2560_v40 = vld [vmem:[#allocation5 + $0x4c] ss:$16 sps:$4 sm:$0xff]  }
  0x50   :  { %1345 = vmatprep.subr.bf16.mxu1 %v2485_v42  ;;  %v2557_v35 = vld [vmem:[#allocation5 + $0x424] ss:$16 sps:$4 sm:$0xff]   ;;  %v2555_v39 = vld [vmem:[#allocation5 + $0x420] ss:$16 sps:$4 sm:$0xff]   ;;  %v2558_v42 = vld [vmem:[#allocation5 + $0x48] ss:$16 sps:$4 sm:$0xff]  }
  0x51   :  { %v73_v36 = vld [vmem:[#allocation3 + $0x28] sm:$0xff] }
  0x52   :  { %1305 = vmatpush2.bf16.msra.mxu0 %v2487_v43  ;;  %v2959_v37 = vpack.c.bf16 %v73_v36, %v73_v36  ;;  %v2563_v41 = vld [vmem:[#allocation5 + $0x404] ss:$16 sps:$4 sm:$0xff]   ;;  %v2561_v43 = vld [vmem:[#allocation5 + $0x400] ss:$16 sps:$4 sm:$0xff]   ;;  %v2641_v36 = vld [vmem:[#allocation5 + $0x26c] ss:$16 sps:$4 sm:$0xff]  }
  0x53   :  { %1346 = vmatpush2.bf16.msra.mxu1 %v2488_v44  ;;  %1306 = vmatprep.subr.bf16.mxu0 %v2489_v45  ;;  %v2566_v44 = vld [vmem:[#allocation5 + $0x2c] ss:$16 sps:$4 sm:$0xff]   ;;  %v2569_v45 = vld [vmem:[#allocation5 + $0x5e4] ss:$16 sps:$4 sm:$0xff]   ;;  %v2567_v47 = vld [vmem:[#allocation5 + $0x5e0] ss:$16 sps:$4 sm:$0xff]  }
  0x54   :  { %1347 = vmatprep.subr.bf16.mxu1 %v2491_v46  ;;  %v2564_v46 = vld [vmem:[#allocation5 + $0x28] ss:$16 sps:$4 sm:$0xff]   ;;  %v2573_v51 = vld [vmem:[#allocation5 + $0x5c0] ss:$16 sps:$4 sm:$0xff]   ;;  %v2605_v6 = vld [vmem:[#allocation5 + $0x524] ss:$16 sps:$4 sm:$0xff]  }
  0x56   :  { %1307 = vmatpush2.bf16.msra.mxu0 %v2493_v48  ;;  %v2572_v48 = vld [vmem:[#allocation5 + $0xc] ss:$16 sps:$4 sm:$0xff]  }
  0x57   :  { %1348 = vmatpush2.bf16.msra.mxu1 %v2494_v49  ;;  %1308 = vmatprep.subr.bf16.mxu0 %v2495_v52  ;;  %v2575_v49 = vld [vmem:[#allocation5 + $0x5c4] ss:$16 sps:$4 sm:$0xff]   ;;  %v2578_v52 = vld [vmem:[#allocation5 + $0x1ec] ss:$16 sps:$4 sm:$0xff]  }
  0x58   :  { %1349 = vmatprep.subr.bf16.mxu1 %v2497_v54  ;;  %v2581_v54 = vld [vmem:[#allocation5 + $0x5a4] ss:$16 sps:$4 sm:$0xff]  }
  0x5a   :  { %1309 = vmatpush2.bf16.msra.mxu0 %v2499_v55  ;;  %v2576_v55 = vld [vmem:[#allocation5 + $0x1e8] ss:$16 sps:$4 sm:$0xff]  }
  0x5b   :  { %1350 = vmatpush2.bf16.msra.mxu1 %v2500_v56  ;;  %1310 = vmatprep.subr.bf16.mxu0 %v2501_v57  ;;  %v2579_v56 = vld [vmem:[#allocation5 + $0x5a0] ss:$16 sps:$4 sm:$0xff]   ;;  %v2584_v57 = vld [vmem:[#allocation5 + $0x1cc] ss:$16 sps:$4 sm:$0xff]  }
  0x5c   :  { %1351 = vmatprep.subr.bf16.mxu1 %v2503_v58  ;;  %v2587_v58 = vld [vmem:[#allocation5 + $0x584] ss:$16 sps:$4 sm:$0xff]  }
  0x5e   :  { %1311 = vmatpush2.bf16.msra.mxu0 %v2505_v59  ;;  %v2582_v59 = vld [vmem:[#allocation5 + $0x1c8] ss:$16 sps:$4 sm:$0xff]  }
  0x5f   :  { %1352 = vmatpush2.bf16.msra.mxu1 %v2506_v60  ;;  %1312 = vmatprep.subr.bf16.mxu0 %v2507_v61  ;;  %v2585_v60 = vld [vmem:[#allocation5 + $0x580] ss:$16 sps:$4 sm:$0xff]   ;;  %v2590_v61 = vld [vmem:[#allocation5 + $0x1ac] ss:$16 sps:$4 sm:$0xff]  }
  0x60   :  { %1353 = vmatprep.subr.bf16.mxu1 %v2509_v62  ;;  %v2593_v62 = vld [vmem:[#allocation5 + $0x564] ss:$16 sps:$4 sm:$0xff]  }
  0x62   :  { %1313 = vmatpush2.bf16.msra.mxu0 %v2511_v63  ;;  %v2588_v63 = vld [vmem:[#allocation5 + $0x1a8] ss:$16 sps:$4 sm:$0xff]  }
  0x63   :  { %1354 = vmatpush2.bf16.msra.mxu1 %v2512_v0  ;;  %1314 = vmatprep.subr.bf16.mxu0 %v2513_v1  ;;  %v2591_v0 = vld [vmem:[#allocation5 + $0x560] ss:$16 sps:$4 sm:$0xff]   ;;  %v2596_v1 = vld [vmem:[#allocation5 + $0x18c] ss:$16 sps:$4 sm:$0xff]  }
  0x64   :  { %1355 = vmatprep.subr.bf16.mxu1 %v2515_v2  ;;  %v2599_v2 = vld [vmem:[#allocation5 + $0x544] ss:$16 sps:$4 sm:$0xff]  }
  0x66   :  { %1315 = vmatpush2.bf16.msra.mxu0 %v2517_v3  ;;  %v2594_v3 = vld [vmem:[#allocation5 + $0x188] ss:$16 sps:$4 sm:$0xff]  }
  0x67   :  { %1356 = vmatpush2.bf16.msra.mxu1 %v2518_v4  ;;  %1366 = vmatprep.subr.bf16.mxu0 %v2521_v7  ;;  %v2597_v4 = vld [vmem:[#allocation5 + $0x540] ss:$16 sps:$4 sm:$0xff]   ;;  %v2600_v7 = vld [vmem:[#allocation5 + $0x168] ss:$16 sps:$4 sm:$0xff]  }
  0x68   :  { %1421 = vmatprep.subr.bf16.mxu1 %v2524_v8  ;;  %v2603_v8 = vld [vmem:[#allocation5 + $0x520] ss:$16 sps:$4 sm:$0xff]  }
  0x69   :  { %1317 = vmatmul.mubr.bf16.vlgmr.msra.gmra.mxu0 %v2947_v9 }
  0x6a   :  { %1358 = vmatmul.mubr.bf16.vlgmr.msra.gmra.mxu1 %v2949_v10  ;;  %1367 = vmatpush1.bf16.msra.mxu0 %v2519_v11  ;;  %v2608_v11 = vld [vmem:[#allocation5 + $0x14c] ss:$16 sps:$4 sm:$0xff]  }
  0x6b   :  { %1422 = vmatpush1.bf16.msra.mxu1 %v2522_v12  ;;  %1368 = vmatprep.subr.bf16.mxu0 %v2527_v13  ;;  %v2611_v12 = vld [vmem:[#allocation5 + $0x504] ss:$16 sps:$4 sm:$0xff]   ;;  %v2606_v13 = vld [vmem:[#allocation5 + $0x148] ss:$16 sps:$4 sm:$0xff]  }
  0x6c   :  { %1439 = vmatprep.mubr.bf16.mxu1 %v2888_v17  ;;  %1448 = vmatprep.subr.bf16.mxu1 %v2530_v14  ;;  %v2609_v14 = vld [vmem:[#allocation5 + $0x500] ss:$16 sps:$4 sm:$0xff]  }
  0x6d   :  { %1398 = vmatprep.mubr.bf16.mxu0 %v2959_v37 }
  0x6e   :  { %1369 = vmatpush1.bf16.msra.mxu0 %v2525_v15  ;;  %v2614_v15 = vld [vmem:[#allocation5 + $0x12c] ss:$16 sps:$4 sm:$0xff]  }
  0x6f   :  { %1370 = vmatprep.subr.bf16.mxu0 %v2533_v18  ;;  %v2617_v18 = vld [vmem:[#allocation5 + $0x2ec] ss:$16 sps:$4 sm:$0xff]  }
  0x72   :  { %2347 = vmatmul.mubr.msk.bf16.vlgmr.msra.gmra.mxu1 %vm1280_vm0, %v2954_v20  ;;  %1371 = vmatpush1.bf16.msra.mxu0 %v2531_v21  ;;  %v2962_v21 = vpack.c.bf16 %v72_v16, %v72_v16  ;;  %v2704_v16 = vld [vmem:[#allocation5 + $0x54c] ss:$16 sps:$4 sm:$0xff]  }
  0x73   :  { %1449 = vmatpush1.bf16.msra.mxu1 %v2528_v19  ;;  %1372 = vmatprep.subr.bf16.mxu0 %v2539_v23  ;;  %v2612_v19 = vld [vmem:[#allocation5 + $0x128] ss:$16 sps:$4 sm:$0xff]   ;;  %v2620_v23 = vld [vmem:[#allocation5 + $0x10c] ss:$16 sps:$4 sm:$0xff]  }
  0x74   :  { %1450 = vmatprep.subr.bf16.mxu1 %v2536_v22  ;;  %1480 = vmatprep.mubr.bf16.mxu1 %v2941_v50  ;;  %v2570_v50 = vld [vmem:[#allocation5 + $0x8] ss:$16 sps:$4 sm:$0xff]  }
  0x75   :  { %v2615_v22 = vld [vmem:[#allocation5 + $0x2e8] ss:$16 sps:$4 sm:$0xff]  }
  0x76   :  { %1373 = vmatpush1.bf16.msra.mxu0 %v2537_v25  ;;  %v2618_v25 = vld [vmem:[#allocation5 + $0x108] ss:$16 sps:$4 sm:$0xff]  }
  0x77   :  { %1451 = vmatpush1.bf16.msra.mxu1 %v2534_v24  ;;  %1374 = vmatprep.subr.bf16.mxu0 %v2545_v27  ;;  %v2623_v24 = vld [vmem:[#allocation5 + $0x2cc] ss:$16 sps:$4 sm:$0xff]  }
  0x78   :  { %1452 = vmatprep.subr.bf16.mxu1 %v2542_v26  ;;  %v2621_v26 = vld [vmem:[#allocation5 + $0x2c8] ss:$16 sps:$4 sm:$0xff]   ;;  %v2626_v27 = vld [vmem:[#allocation5 + $0x4ec] ss:$16 sps:$4 sm:$0xff]  }
  0x7a   :  { %1375 = vmatpush1.bf16.msra.mxu0 %v2543_v29  ;;  %v2624_v29 = vld [vmem:[#allocation5 + $0x4e8] ss:$16 sps:$4 sm:$0xff]  }
  0x7b   :  { %1453 = vmatpush1.bf16.msra.mxu1 %v2540_v28  ;;  %1376 = vmatprep.subr.bf16.mxu0 %v2551_v31  ;;  %v2629_v28 = vld [vmem:[#allocation5 + $0x2ac] ss:$16 sps:$4 sm:$0xff]  }
  0x7c   :  { %1454 = vmatprep.subr.bf16.mxu1 %v2548_v30  ;;  %v2627_v30 = vld [vmem:[#allocation5 + $0x2a8] ss:$16 sps:$4 sm:$0xff]   ;;  %v2632_v31 = vld [vmem:[#allocation5 + $0x4cc] ss:$16 sps:$4 sm:$0xff]  }
  0x7e   :  { %1377 = vmatpush1.bf16.msra.mxu0 %v2549_v33  ;;  %v2630_v33 = vld [vmem:[#allocation5 + $0x4c8] ss:$16 sps:$4 sm:$0xff]  }
  0x7f   :  { %1455 = vmatpush1.bf16.msra.mxu1 %v2546_v32  ;;  %1378 = vmatprep.subr.bf16.mxu0 %v2557_v35  ;;  %v2635_v32 = vld [vmem:[#allocation5 + $0x28c] ss:$16 sps:$4 sm:$0xff]  }
  0x80   :  { %1456 = vmatprep.subr.bf16.mxu1 %v2554_v34  ;;  %v2633_v34 = vld [vmem:[#allocation5 + $0x288] ss:$16 sps:$4 sm:$0xff]   ;;  %v2638_v35 = vld [vmem:[#allocation5 + $0x4ac] ss:$16 sps:$4 sm:$0xff]  }
  0x82   :  { %1379 = vmatpush1.bf16.msra.mxu0 %v2555_v39  ;;  %v2644_v39 = vld [vmem:[#allocation5 + $0x48c] ss:$16 sps:$4 sm:$0xff]  }
  0x83   :  { %1457 = vmatpush1.bf16.msra.mxu1 %v2552_v38  ;;  %1380 = vmatprep.subr.bf16.mxu0 %v2563_v41  ;;  %v2636_v38 = vld [vmem:[#allocation5 + $0x4a8] ss:$16 sps:$4 sm:$0xff]  }
  0x84   :  { %1458 = vmatprep.subr.bf16.mxu1 %v2560_v40  ;;  %v2647_v40 = vld [vmem:[#allocation5 + $0x24c] ss:$16 sps:$4 sm:$0xff]   ;;  %v2642_v41 = vld [vmem:[#allocation5 + $0x488] ss:$16 sps:$4 sm:$0xff]  }
  0x86   :  { %1381 = vmatpush1.bf16.msra.mxu0 %v2561_v43  ;;  %v2653_v43 = vld [vmem:[#allocation5 + $0x22c] ss:$16 sps:$4 sm:$0xff]  }
  0x87   :  { %1459 = vmatpush1.bf16.msra.mxu1 %v2558_v42  ;;  %1382 = vmatprep.subr.bf16.mxu0 %v2569_v45  ;;  %v2650_v42 = vld [vmem:[#allocation5 + $0x46c] ss:$16 sps:$4 sm:$0xff]  }
  0x88   :  { %1460 = vmatprep.subr.bf16.mxu1 %v2566_v44  ;;  %v2648_v44 = vld [vmem:[#allocation5 + $0x468] ss:$16 sps:$4 sm:$0xff]   ;;  %v2656_v45 = vld [vmem:[#allocation5 + $0x44c] ss:$16 sps:$4 sm:$0xff]  }
  0x8a   :  { %1383 = vmatpush2.bf16.msra.mxu0 %v2567_v47  ;;  %v2654_v47 = vld [vmem:[#allocation5 + $0x448] ss:$16 sps:$4 sm:$0xff]  }
  0x8b   :  { %1461 = vmatpush1.bf16.msra.mxu1 %v2564_v46  ;;  %1384 = vmatprep.subr.bf16.mxu0 %v2575_v49  ;;  %v2659_v46 = vld [vmem:[#allocation5 + $0x20c] ss:$16 sps:$4 sm:$0xff]  }
  0x8c   :  { %1462 = vmatprep.subr.bf16.mxu1 %v2572_v48  ;;  %v2657_v48 = vld [vmem:[#allocation5 + $0x208] ss:$16 sps:$4 sm:$0xff]   ;;  %v2662_v49 = vld [vmem:[#allocation5 + $0x42c] ss:$16 sps:$4 sm:$0xff]  }
  0x8e   :  { %1385 = vmatpush2.bf16.msra.mxu0 %v2573_v51  ;;  %v2660_v51 = vld [vmem:[#allocation5 + $0x428] ss:$16 sps:$4 sm:$0xff]  }
  0x8f   :  { %1463 = vmatpush1.bf16.msra.mxu1 %v2570_v50  ;;  %1386 = vmatprep.subr.bf16.mxu0 %v2581_v54  ;;  %v2665_v50 = vld [vmem:[#allocation5 + $0x3ec] ss:$16 sps:$4 sm:$0xff]  }
  0x90   :  { %1464 = vmatprep.subr.bf16.mxu1 %v2578_v52  ;;  %v2663_v52 = vld [vmem:[#allocation5 + $0x3e8] ss:$16 sps:$4 sm:$0xff]   ;;  %v2668_v54 = vld [vmem:[#allocation5 + $0x40c] ss:$16 sps:$4 sm:$0xff]  }
  0x92   :  { %1387 = vmatpush2.bf16.msra.mxu0 %v2579_v56  ;;  %v2666_v56 = vld [vmem:[#allocation5 + $0x408] ss:$16 sps:$4 sm:$0xff]  }
  0x93   :  { %1465 = vmatpush2.bf16.msra.mxu1 %v2576_v55  ;;  %1388 = vmatprep.subr.bf16.mxu0 %v2587_v58  ;;  %v2671_v55 = vld [vmem:[#allocation5 + $0x3cc] ss:$16 sps:$4 sm:$0xff]  }
  0x94   :  { %1466 = vmatprep.subr.bf16.mxu1 %v2584_v57  ;;  %v2669_v57 = vld [vmem:[#allocation5 + $0x3c8] ss:$16 sps:$4 sm:$0xff]   ;;  %v2674_v58 = vld [vmem:[#allocation5 + $0x5ec] ss:$16 sps:$4 sm:$0xff]  }
  0x96   :  { %1389 = vmatpush2.bf16.msra.mxu0 %v2585_v60  ;;  %v2672_v60 = vld [vmem:[#allocation5 + $0x5e8] ss:$16 sps:$4 sm:$0xff]  }
  0x97   :  { %1467 = vmatpush2.bf16.msra.mxu1 %v2582_v59  ;;  %1390 = vmatprep.subr.bf16.mxu0 %v2593_v62  ;;  %v2677_v59 = vld [vmem:[#allocation5 + $0x3ac] ss:$16 sps:$4 sm:$0xff]  }
  0x98   :  { %1468 = vmatprep.subr.bf16.mxu1 %v2590_v61  ;;  %v2675_v61 = vld [vmem:[#allocation5 + $0x3a8] ss:$16 sps:$4 sm:$0xff]   ;;  %v2680_v62 = vld [vmem:[#allocation5 + $0x5cc] ss:$16 sps:$4 sm:$0xff]  }
  0x9a   :  { %1391 = vmatpush2.bf16.msra.mxu0 %v2591_v0  ;;  %v2678_v0 = vld [vmem:[#allocation5 + $0x5c8] ss:$16 sps:$4 sm:$0xff]  }
  0x9b   :  { %1469 = vmatpush2.bf16.msra.mxu1 %v2588_v63  ;;  %1392 = vmatprep.subr.bf16.mxu0 %v2599_v2  ;;  %v2683_v63 = vld [vmem:[#allocation5 + $0x38c] ss:$16 sps:$4 sm:$0xff]  }
  0x9c   :  { %1470 = vmatprep.subr.bf16.mxu1 %v2596_v1  ;;  %v2681_v1 = vld [vmem:[#allocation5 + $0x388] ss:$16 sps:$4 sm:$0xff]   ;;  %v2686_v2 = vld [vmem:[#allocation5 + $0x5ac] ss:$16 sps:$4 sm:$0xff]  }
  0x9e   :  { %1393 = vmatpush2.bf16.msra.mxu0 %v2597_v4  ;;  %v2684_v4 = vld [vmem:[#allocation5 + $0x5a8] ss:$16 sps:$4 sm:$0xff]  }
  0x9f   :  { %1471 = vmatpush2.bf16.msra.mxu1 %v2594_v3  ;;  %1394 = vmatprep.subr.bf16.mxu0 %v2605_v6  ;;  %v2689_v3 = vld [vmem:[#allocation5 + $0x36c] ss:$16 sps:$4 sm:$0xff]  }
  0xa0   :  { %1472 = vmatprep.subr.bf16.mxu1 %v2602_v5  ;;  %v2687_v5 = vld [vmem:[#allocation5 + $0x368] ss:$16 sps:$4 sm:$0xff]   ;;  %v2692_v6 = vld [vmem:[#allocation5 + $0x58c] ss:$16 sps:$4 sm:$0xff]  }
  0xa2   :  { %1395 = vmatpush2.bf16.msra.mxu0 %v2603_v8  ;;  %v2690_v8 = vld [vmem:[#allocation5 + $0x588] ss:$16 sps:$4 sm:$0xff]  }
  0xa3   :  { %1473 = vmatpush2.bf16.msra.mxu1 %v2600_v7  ;;  %1396 = vmatprep.subr.bf16.mxu0 %v2611_v12  ;;  %v2695_v7 = vld [vmem:[#allocation5 + $0x34c] ss:$16 sps:$4 sm:$0xff]  }
  0xa4   :  { %1474 = vmatprep.subr.bf16.mxu1 %v2608_v11  ;;  %v2693_v11 = vld [vmem:[#allocation5 + $0x348] ss:$16 sps:$4 sm:$0xff]   ;;  %v2698_v12 = vld [vmem:[#allocation5 + $0x56c] ss:$16 sps:$4 sm:$0xff]  }
  0xa6   :  { %1397 = vmatpush2.bf16.msra.mxu0 %v2609_v14  ;;  %v2696_v14 = vld [vmem:[#allocation5 + $0x568] ss:$16 sps:$4 sm:$0xff]  }
  0xa7   :  { %1475 = vmatpush2.bf16.msra.mxu1 %v2606_v13  ;;  %1489 = vmatprep.subr.bf16.mxu0 %v2617_v18  ;;  %v2701_v13 = vld [vmem:[#allocation5 + $0x32c] ss:$16 sps:$4 sm:$0xff]  }
  0xa8   :  { %1476 = vmatprep.subr.bf16.mxu1 %v2614_v15  ;;  %v2699_v15 = vld [vmem:[#allocation5 + $0x328] ss:$16 sps:$4 sm:$0xff]   ;;  %v2707_v18 = vld [vmem:[#allocation5 + $0x30c] ss:$16 sps:$4 sm:$0xff]  }
  0xa9   :  { %1399 = vmatmul.mubr.bf16.vlgmr.msra.gmra.mxu0 %v2962_v21 }
  0xaa   :  { %1490 = vmatpush1.bf16.msra.mxu0 %v2615_v22  ;;  %1521 = vmatprep.mubr.bf16.mxu0 %v2943_v53  ;;  %v2639_v53 = vld [vmem:[#allocation5 + $0x268] ss:$16 sps:$4 sm:$0xff]  }
  0xab   :  { %1477 = vmatpush2.bf16.msra.mxu1 %v2612_v19  ;;  %1491 = vmatprep.subr.bf16.mxu0 %v2623_v24  ;;  %v2702_v19 = vld [vmem:[#allocation5 + $0x548] ss:$16 sps:$4 sm:$0xff]   ;;  %v2713_v24 = vld [vmem:[#allocation5 + $0x60c] ss:$16 sps:$4 sm:$0xff]  }
  0xac   :  { %1478 = vmatprep.subr.bf16.mxu1 %v2620_v23  ;;  %v2705_v22 = vld [vmem:[#allocation5 + $0x308] ss:$16 sps:$4 sm:$0xff]   ;;  %v2710_v23 = vld [vmem:[#allocation5 + $0x52c] ss:$16 sps:$4 sm:$0xff]  }
  0xae   :  { %1492 = vmatpush1.bf16.msra.mxu0 %v2621_v26  ;;  %v2711_v26 = vld [vmem:[#allocation5 + $0x608] ss:$16 sps:$4 sm:$0xff]  }
  0xaf   :  { %1479 = vmatpush2.bf16.msra.mxu1 %v2618_v25  ;;  %1493 = vmatprep.subr.bf16.mxu0 %v2629_v28  ;;  %v2708_v25 = vld [vmem:[#allocation5 + $0x528] ss:$16 sps:$4 sm:$0xff]   ;;  %v2719_v28 = vld [vmem:[#allocation7 + $0x74] ss:$8 sps:$4 sm:$0xff]  }
  0xb0   :  { %1530 = vmatprep.subr.bf16.mxu1 %v2626_v27  ;;  %v2716_v27 = vld [vmem:[#allocation5 + $0x50c] ss:$16 sps:$4 sm:$0xff]  }
  0xb2   :  { %1481 = vmatmul.mubr.bf16.vlgmr.msra.gmra.mxu1 %v2947_v9  ;;  %1494 = vmatpush1.bf16.msra.mxu0 %v2627_v30  ;;  %v2645_v9 = vld [vmem:[#allocation5 + $0x248] ss:$16 sps:$4 sm:$0xff]  }
  0xb3   :  { %1531 = vmatpush1.bf16.msra.mxu1 %v2624_v29  ;;  %1495 = vmatprep.subr.bf16.mxu0 %v2635_v32  ;;  %v2714_v29 = vld [vmem:[#allocation5 + $0x508] ss:$16 sps:$4 sm:$0xff]  }
  0xb4   :  { %1532 = vmatprep.subr.bf16.mxu1 %v2632_v31  ;;  %1562 = vmatprep.mubr.bf16.mxu1 %v2959_v37  ;;  %v2651_v37 = vld [vmem:[#allocation5 + $0x228] ss:$16 sps:$4 sm:$0xff]   ;;  %v2722_v31 = vld [vmem:[#allocation7 + $0x64] ss:$8 sps:$4 sm:$0xff]  }
  0xb5   :  { %v2717_v30 = vld [vmem:[#allocation7 + $0x70] ss:$8 sps:$4 sm:$0xff]   ;;  %v2720_v32 = vld [vmem:[#allocation7 + $0x60] ss:$8 sps:$4 sm:$0xff]  }
  0xb6   :  { %1496 = vmatpush1.bf16.msra.mxu0 %v2633_v34  ;;  %v2728_v34 = vld [vmem:[#allocation7 + $0x44] ss:$8 sps:$4 sm:$0xff]  }
  0xb7   :  { %1533 = vmatpush1.bf16.msra.mxu1 %v2630_v33  ;;  %1497 = vmatprep.subr.bf16.mxu0 %v2641_v36  ;;  %v2725_v33 = vld [vmem:[#allocation7 + $0x54] ss:$8 sps:$4 sm:$0xff]  }
  0xb8   :  { %1534 = vmatprep.subr.bf16.mxu1 %v2638_v35  ;;  %v2765_v35 = vld [vmem:[#allocation7 + $0x170] ss:$8 sps:$4 sm:$0xff]   ;;  %v2767_v36 = vld [vmem:[#allocation7 + $0x174] ss:$8 sps:$4 sm:$0xff]  }
  0xba   :  { %1498 = vmatpush1.bf16.msra.mxu0 %v2639_v53  ;;  %v2768_v53 = vld [vmem:[#allocation7 + $0x160] ss:$8 sps:$4 sm:$0xff]  }
  0xbb   :  { %1535 = vmatpush1.bf16.msra.mxu1 %v2636_v38  ;;  %1499 = vmatprep.subr.bf16.mxu0 %v2647_v40  ;;  %v2726_v38 = vld [vmem:[#allocation7 + $0x40] ss:$8 sps:$4 sm:$0xff]   ;;  %v2771_v40 = vld [vmem:[#allocation7 + $0x150] ss:$8 sps:$4 sm:$0xff]  }
  0xbc   :  { %1536 = vmatprep.subr.bf16.mxu1 %v2644_v39  ;;  %v2729_v39 = vld [vmem:[#allocation7 + $0x30] ss:$8 sps:$4 sm:$0xff]  }
  0xbe   :  { %1500 = vmatpush1.bf16.msra.mxu0 %v2645_v9  ;;  %v2776_v9 = vld [vmem:[#allocation7 + $0x144] ss:$8 sps:$4 sm:$0xff]  }
  0xbf   :  { %1537 = vmatpush1.bf16.msra.mxu1 %v2642_v41  ;;  %1501 = vmatprep.subr.bf16.mxu0 %v2653_v43  ;;  %v2734_v41 = vld [vmem:[#allocation7 + $0x24] ss:$8 sps:$4 sm:$0xff]   ;;  %v2774_v43 = vld [vmem:[#allocation7 + $0x140] ss:$8 sps:$4 sm:$0xff]  }
  0xc0   :  { %1538 = vmatprep.subr.bf16.mxu1 %v2650_v42  ;;  %v2732_v42 = vld [vmem:[#allocation7 + $0x20] ss:$8 sps:$4 sm:$0xff]  }
  0xc2   :  { %1502 = vmatpush1.bf16.msra.mxu0 %v2651_v37  ;;  %v2779_v37 = vld [vmem:[#allocation7 + $0x134] ss:$8 sps:$4 sm:$0xff]  }
  0xc3   :  { %1539 = vmatpush1.bf16.msra.mxu1 %v2648_v44  ;;  %1503 = vmatprep.subr.bf16.mxu0 %v2659_v46  ;;  %v2737_v44 = vld [vmem:[#allocation7 + $0x14] ss:$8 sps:$4 sm:$0xff]   ;;  %v2777_v46 = vld [vmem:[#allocation7 + $0x130] ss:$8 sps:$4 sm:$0xff]  }
  0xc4   :  { %1540 = vmatprep.subr.bf16.mxu1 %v2656_v45  ;;  %v2735_v45 = vld [vmem:[#allocation7 + $0x10] ss:$8 sps:$4 sm:$0xff]  }
  0xc6   :  { %1504 = vmatpush1.bf16.msra.mxu0 %v2657_v48  ;;  %v2782_v48 = vld [vmem:[#allocation7 + $0x124] ss:$8 sps:$4 sm:$0xff]  }
  0xc7   :  { %1541 = vmatpush1.bf16.msra.mxu1 %v2654_v47  ;;  %1505 = vmatprep.subr.bf16.mxu0 %v2665_v50  ;;  %v2740_v47 = vld [vmem:[#allocation7 + $0x4] ss:$8 sps:$4 sm:$0xff]   ;;  %v2780_v50 = vld [vmem:[#allocation7 + $0x120] ss:$8 sps:$4 sm:$0xff]  }
  0xc8   :  { %1542 = vmatprep.subr.bf16.mxu1 %v2662_v49  ;;  %v2738_v49 = vld [vmem:[#allocation7] ss:$8 sps:$4 sm:$0xff]  }
  0xca   :  { %1506 = vmatpush2.bf16.msra.mxu0 %v2663_v52  ;;  %v2785_v52 = vld [vmem:[#allocation7 + $0x114] ss:$8 sps:$4 sm:$0xff]  }
  0xcb   :  { %1543 = vmatpush1.bf16.msra.mxu1 %v2660_v51  ;;  %1507 = vmatprep.subr.bf16.mxu0 %v2671_v55  ;;  %v2743_v51 = vld [vmem:[#allocation7 + $0xf4] ss:$8 sps:$4 sm:$0xff]   ;;  %v2783_v55 = vld [vmem:[#allocation7 + $0x110] ss:$8 sps:$4 sm:$0xff]  }
  0xcc   :  { %1544 = vmatprep.subr.bf16.mxu1 %v2668_v54  ;;  %v2741_v54 = vld [vmem:[#allocation7 + $0xf0] ss:$8 sps:$4 sm:$0xff]  }
  0xce   :  { %1508 = vmatpush2.bf16.msra.mxu0 %v2669_v57  ;;  %v2788_v57 = vld [vmem:[#allocation7 + $0x104] ss:$8 sps:$4 sm:$0xff]  }
  0xcf   :  { %1545 = vmatpush1.bf16.msra.mxu1 %v2666_v56  ;;  %1509 = vmatprep.subr.bf16.mxu0 %v2677_v59  ;;  %v2746_v56 = vld [vmem:[#allocation7 + $0xe4] ss:$8 sps:$4 sm:$0xff]   ;;  %v2786_v59 = vld [vmem:[#allocation7 + $0x100] ss:$8 sps:$4 sm:$0xff]  }
  0xd0   :  { %1546 = vmatprep.subr.bf16.mxu1 %v2674_v58  ;;  %v2744_v58 = vld [vmem:[#allocation7 + $0xe0] ss:$8 sps:$4 sm:$0xff]  }
  0xd2   :  { %1510 = vmatpush2.bf16.msra.mxu0 %v2675_v61  ;;  %v2791_v61 = vld [vmem:[#allocation7 + $0x1f4] ss:$8 sps:$4 sm:$0xff]  }
  0xd3   :  { %1547 = vmatpush2.bf16.msra.mxu1 %v2672_v60  ;;  %1511 = vmatprep.subr.bf16.mxu0 %v2683_v63  ;;  %v2749_v60 = vld [vmem:[#allocation7 + $0xd4] ss:$8 sps:$4 sm:$0xff]   ;;  %v2789_v63 = vld [vmem:[#allocation7 + $0x1f0] ss:$8 sps:$4 sm:$0xff]  }
  0xd4   :  { %1548 = vmatprep.subr.bf16.mxu1 %v2680_v62  ;;  %v2747_v62 = vld [vmem:[#allocation7 + $0xd0] ss:$8 sps:$4 sm:$0xff]  }
  0xd6   :  { %1512 = vmatpush2.bf16.msra.mxu0 %v2681_v1  ;;  %v2794_v1 = vld [vmem:[#allocation7 + $0x1e4] ss:$8 sps:$4 sm:$0xff]  }
  0xd7   :  { %1549 = vmatpush2.bf16.msra.mxu1 %v2678_v0  ;;  %1513 = vmatprep.subr.bf16.mxu0 %v2689_v3  ;;  %v2752_v0 = vld [vmem:[#allocation7 + $0xc4] ss:$8 sps:$4 sm:$0xff]   ;;  %v2792_v3 = vld [vmem:[#allocation7 + $0x1e0] ss:$8 sps:$4 sm:$0xff]  }
  0xd8   :  { %1550 = vmatprep.subr.bf16.mxu1 %v2686_v2  ;;  %v2750_v2 = vld [vmem:[#allocation7 + $0xc0] ss:$8 sps:$4 sm:$0xff]  }
  0xda   :  { %1514 = vmatpush2.bf16.msra.mxu0 %v2687_v5  ;;  %v2797_v5 = vld [vmem:[#allocation7 + $0x1d4] ss:$8 sps:$4 sm:$0xff]  }
  0xdb   :  { %1551 = vmatpush2.bf16.msra.mxu1 %v2684_v4  ;;  %1515 = vmatprep.subr.bf16.mxu0 %v2695_v7  ;;  %v2755_v4 = vld [vmem:[#allocation7 + $0xb4] ss:$8 sps:$4 sm:$0xff]   ;;  %v2795_v7 = vld [vmem:[#allocation7 + $0x1d0] ss:$8 sps:$4 sm:$0xff]  }
  0xdc   :  { %1552 = vmatprep.subr.bf16.mxu1 %v2692_v6  ;;  %v2753_v6 = vld [vmem:[#allocation7 + $0xb0] ss:$8 sps:$4 sm:$0xff]  }
  0xde   :  { %1516 = vmatpush2.bf16.msra.mxu0 %v2693_v11  ;;  %v2756_v11 = vld [vmem:[#allocation7 + $0xa0] ss:$8 sps:$4 sm:$0xff]  }
  0xdf   :  { %1553 = vmatpush2.bf16.msra.mxu1 %v2690_v8  ;;  %1517 = vmatprep.subr.bf16.mxu0 %v2701_v13  ;;  %v2758_v8 = vld [vmem:[#allocation7 + $0xa4] ss:$8 sps:$4 sm:$0xff]   ;;  %v2759_v13 = vld [vmem:[#allocation7 + $0x90] ss:$8 sps:$4 sm:$0xff]  }
  0xe0   :  { %1554 = vmatprep.subr.bf16.mxu1 %v2698_v12  ;;  %v2761_v12 = vld [vmem:[#allocation7 + $0x94] ss:$8 sps:$4 sm:$0xff]  }
  0xe2   :  { %1518 = vmatpush2.bf16.msra.mxu0 %v2699_v15  ;;  %v2800_v15 = vld [vmem:[#allocation7 + $0x1c4] ss:$8 sps:$4 sm:$0xff]  }
  0xe3   :  { %1555 = vmatpush2.bf16.msra.mxu1 %v2696_v14  ;;  %1519 = vmatprep.subr.bf16.mxu0 %v2707_v18  ;;  %v2764_v14 = vld [vmem:[#allocation7 + $0x84] ss:$8 sps:$4 sm:$0xff]  }
  0xe4   :  { %1556 = vmatprep.subr.bf16.mxu1 %v2704_v16 }
  0xe6   :  { %1520 = vmatpush2.bf16.msra.mxu0 %v2705_v22  ;;  %v2762_v22 = vld [vmem:[#allocation7 + $0x80] ss:$8 sps:$4 sm:$0xff]  }
  0xe7   :  { %1557 = vmatpush2.bf16.msra.mxu1 %v2702_v19  ;;  %1585 = vmatprep.subr.bf16.mxu0 %v2713_v24  ;;  %v2798_v19 = vld [vmem:[#allocation7 + $0x1c0] ss:$8 sps:$4 sm:$0xff]  }
  0xe8   :  { %1558 = vmatprep.subr.bf16.mxu1 %v2710_v23 }
  0xe9   :  { %1522 = vmatmul.mubr.bf16.vlgmr.msra.gmra.mxu0 %v2949_v10  ;;  %v2723_v10 = vld [vmem:[#allocation7 + $0x50] ss:$8 sps:$4 sm:$0xff]  }
  0xea   :  { %1586 = vmatpush1.bf16.msra.mxu0 %v2711_v26  ;;  %1603 = vmatprep.mubr.bf16.mxu0 %v2888_v17  ;;  %v2770_v17 = vld [vmem:[#allocation7 + $0x164] ss:$8 sps:$4 sm:$0xff]  }
  0xeb   :  { %1559 = vmatpush2.bf16.msra.mxu1 %v2708_v25  ;;  %2024 = vmatprep.subr.bf16.mxu0 %v2719_v28  ;;  %v2803_v25 = vld [vmem:[#allocation7 + $0x1b4] ss:$8 sps:$4 sm:$0xff]   ;;  %v2801_v28 = vld [vmem:[#allocation7 + $0x1b0] ss:$8 sps:$4 sm:$0xff]  }
  0xec   :  { %1560 = vmatprep.subr.bf16.mxu1 %v2716_v27 }
  0xef   :  { %1561 = vmatpush2.bf16.msra.mxu1 %v2714_v29 }
  0xf0   :  { %2065 = vmatprep.subr.bf16.mxu1 %v2767_v36  ;;  %v2807_v36 = vld [vmem:[#allocation7 + $0x190] ss:$8 sps:$4 sm:$0xff]  }
  0xf1   :  { %2348 = vmatmul.mubr.msk.bf16.vlgmr.msra.gmra.mxu0 %vm1280_vm0, %v2954_v20  ;;  %v2773_v20 = vld [vmem:[#allocation7 + $0x154] ss:$8 sps:$4 sm:$0xff]  }
  0xf2   :  { %1563 = vmatmul.mubr.bf16.vlgmr.msra.gmra.mxu1 %v2962_v21  ;;  %2025 = vmatpush1.bf16.msra.mxu0 %v2717_v30  ;;  %v2731_v21 = vld [vmem:[#allocation7 + $0x34] ss:$8 sps:$4 sm:$0xff]  }
  0xf3   :  { %2026 = vmatprep.subr.bf16.mxu0 %v2722_v31  ;;  %2066 = vmatpush1.bf16.msra.mxu1 %v2765_v35  ;;  %v2806_v31 = vld [vmem:[#allocation7 + $0x1a4] ss:$8 sps:$4 sm:$0xff]  }
  0xf4   :  { %2067 = vmatprep.subr.bf16.mxu1 %v2770_v17 }
  0xf6   :  { %2027 = vmatpush1.bf16.msra.mxu0 %v2720_v32 }
  0xf7   :  { %2028 = vmatprep.subr.bf16.mxu0 %v2725_v33  ;;  %2068 = vmatpush1.bf16.msra.mxu1 %v2768_v53  ;;  %v2804_v33 = vld [vmem:[#allocation7 + $0x1a0] ss:$8 sps:$4 sm:$0xff]  }
  0xf8   :  { %2069 = vmatprep.subr.bf16.mxu1 %v2773_v20  ;;  %v2810_v53 = vld [vmem:[#allocation7 + $0x180] ss:$8 sps:$4 sm:$0xff]  }
  0xfa   :  { %2029 = vmatpush1.bf16.msra.mxu0 %v2723_v10 }
  0xfb   :  { %2030 = vmatprep.subr.bf16.mxu0 %v2728_v34  ;;  %2070 = vmatpush1.bf16.msra.mxu1 %v2771_v40  ;;  %v2809_v34 = vld [vmem:[#allocation7 + $0x194] ss:$8 sps:$4 sm:$0xff]   ;;  %v278_v40 = vld [vmem:[%s2997_s2] sm:$0xf] }
  0xfc   :  { %2071 = vmatprep.subr.bf16.mxu1 %v2776_v9 }
  0xfe   :  { %2031 = vmatpush1.bf16.msra.mxu0 %v2726_v38  ;;  %v2812_v38 = vld [vmem:[#allocation7 + $0x184] ss:$8 sps:$4 sm:$0xff]  }
  0xff   :  { %2032 = vmatprep.subr.bf16.mxu0 %v2731_v21  ;;  %2072 = vmatpush1.bf16.msra.mxu1 %v2774_v43  ;;  %v280_v21 = vlaneseq }
 0x100   :  { %2073 = vmatprep.subr.bf16.mxu1 %v2779_v37 }
 0x101   :  { %v281_v20 = vshrl.u32 %v280_v21, 7 }
 0x102   :  { %2033 = vmatpush1.bf16.msra.mxu0 %v2729_v39 }
 0x103   :  { %2034 = vmatprep.subr.bf16.mxu0 %v2734_v41  ;;  %2074 = vmatpush1.bf16.msra.mxu1 %v2777_v46  ;;  %v2973_v39 = vsub.s32 0, %v281_v20  ;;  %v2978_v41 = vsub.s32 1, %v281_v20 }
 0x104   :  { %2075 = vmatprep.subr.bf16.mxu1 %v2782_v48 }
 0x105   :  { %v283_v9 = vrot.slane %v278_v40, %v2973_v39 }
 0x106   :  { %2035 = vmatpush1.bf16.msra.mxu0 %v2732_v42  ;;  %v287_v42 = vrot.slane %v278_v40, %v2978_v41 }
 0x107   :  { %2036 = vmatprep.subr.bf16.mxu0 %v2737_v44  ;;  %2076 = vmatpush1.bf16.msra.mxu1 %v2780_v50 }
 0x108   :  { %2077 = vmatprep.subr.bf16.mxu1 %v2785_v52 }
 0x10a   :  { %2037 = vmatpush1.bf16.msra.mxu0 %v2735_v45 }
 0x10b   :  { %2038 = vmatprep.subr.bf16.mxu0 %v2740_v47  ;;  %2078 = vmatpush1.bf16.msra.mxu1 %v2783_v55 }
 0x10c   :  { %2079 = vmatprep.subr.bf16.mxu1 %v2788_v57 }
 0x10e   :  { %2039 = vmatpush1.bf16.msra.mxu0 %v2738_v49 }
 0x10f   :  { %2040 = vmatprep.subr.bf16.mxu0 %v2743_v51  ;;  %2080 = vmatpush1.bf16.msra.mxu1 %v2786_v59 }
 0x110   :  { %2081 = vmatprep.subr.bf16.mxu1 %v2791_v61 }
 0x112   :  { %2041 = vmatpush2.bf16.msra.mxu0 %v2741_v54 }
 0x113   :  { %2042 = vmatprep.subr.bf16.mxu0 %v2746_v56  ;;  %2082 = vmatpush2.bf16.msra.mxu1 %v2789_v63 }
 0x114   :  { %2083 = vmatprep.subr.bf16.mxu1 %v2794_v1  ;;  %v290_v1 = vsub.s32 2, %v281_v20 }
 0x116   :  { %2043 = vmatpush2.bf16.msra.mxu0 %v2744_v58 }
 0x117   :  { %2044 = vmatprep.subr.bf16.mxu0 %v2749_v60  ;;  %2084 = vmatpush2.bf16.msra.mxu1 %v2792_v3 }
 0x118   :  { %2085 = vmatprep.subr.bf16.mxu1 %v2797_v5 }
 0x11a   :  { %2045 = vmatpush2.bf16.msra.mxu0 %v2747_v62 }
 0x11b   :  { %2046 = vmatprep.subr.bf16.mxu0 %v2752_v0  ;;  %2086 = vmatpush2.bf16.msra.mxu1 %v2795_v7 }
 0x11c   :  { %2087 = vmatprep.subr.bf16.mxu1 %v2800_v15 }
 0x11e   :  { %2047 = vmatpush2.bf16.msra.mxu0 %v2750_v2  ;;  %v294_v2 = vsub.s32 3, %v281_v20 }
 0x11f   :  { %2048 = vmatprep.subr.bf16.mxu0 %v2755_v4  ;;  %2088 = vmatpush2.bf16.msra.mxu1 %v2798_v19  ;;  %v291_v4 = vrot.slane %v278_v40, %v290_v1 }
 0x120   :  { %2089 = vmatprep.subr.bf16.mxu1 %v2803_v25 }
 0x122   :  { %2049 = vmatpush2.bf16.msra.mxu0 %v2753_v6  ;;  %v295_v6 = vrot.slane %v278_v40, %v294_v2 }
 0x123   :  { %2050 = vmatprep.subr.bf16.mxu0 %v2758_v8  ;;  %2090 = vmatpush2.bf16.msra.mxu1 %v2801_v28 }
 0x124   :  { %2091 = vmatprep.subr.bf16.mxu1 %v2806_v31 }
 0x126   :  { %2051 = vmatpush2.bf16.msra.mxu0 %v2756_v11 }
 0x127   :  { %2052 = vmatprep.subr.bf16.mxu0 %v2761_v12  ;;  %2092 = vmatpush2.bf16.msra.mxu1 %v2804_v33 }
 0x128   :  { %2093 = vmatprep.subr.bf16.mxu1 %v2809_v34 }
 0x129   :  { %v1318_v16 = vpop.f32.mrf.mxu0 }
 0x12a   :  { %v1359_v18 = vpop.f32.mrf.mxu1  ;;  %2053 = vmatpush2.bf16.msra.mxu0 %v2759_v13  ;;  %v1319_v43 = vadd.f32 %v1318_v16, %v283_v9 }
 0x12b   :  { %v1320_v23 = vpop.f32.mrf.mxu0  ;;  %2054 = vmatprep.subr.bf16.mxu0 %v2764_v14  ;;  %2094 = vmatpush2.bf16.msra.mxu1 %v2807_v36 }
 0x12c   :  { %v1361_v24 = vpop.f32.mrf.mxu1  ;;  %2095 = vmatprep.subr.bf16.mxu1 %v2812_v38  ;;  %v1321_v44 = vadd.f32 %v1320_v23, %v287_v42  ;;  %v1360_v37 = vadd.f32 %v1359_v18, %v1319_v43 }
 0x12d   :  { %v1322_v26 = vpop.f32.mrf.mxu0 }
 0x12e   :  { %v1363_v27 = vpop.f32.mrf.mxu1  ;;  %2055 = vmatpush2.bf16.msra.mxu0 %v2762_v22  ;;  %v1362_v46 = vadd.f32 %v1361_v24, %v1321_v44  ;;  %v2112_v44 = vld [vmem:[%s3000_s5] sm:$0x3] }
 0x12f   :  { %v1323_v29 = vpop.f32.mrf.mxu0  ;;  %2096 = vmatpush2.bf16.msra.mxu1 %v2810_v53  ;;  %v1692_v53 = vld [vmem:[%s2999_s4] sm:$0x3] }
 0x130   :  { %v1364_v30 = vpop.f32.mrf.mxu1  ;;  %v1697_v21 = vrot.slane %v1692_v53, %v2973_v39  ;;  %v1701_v20 = vrot.slane %v1692_v53, %v2978_v41 }
 0x132   :  { %v1441_v32 = vpop.f32.mrf.mxu1 }
 0x134   :  { %v1443_v10 = vpop.f32.mrf.mxu1 }
 0x136   :  { %v1445_v35 = vpop.f32.mrf.mxu1 }
 0x138   :  { %v1446_v17 = vpop.f32.mrf.mxu1 }
 0x169   :  { %v1400_v45 = vpop.f32.mrf.mxu0 }
 0x16a   :  { %v1401_v47 = vadd.f32 %v1400_v45, %v1360_v37 }
 0x16b   :  { %v1402_v48 = vpop.f32.mrf.mxu0 }
 0x16c   :  { %v1442_v49 = vadd.f32 %v1441_v32, %v1401_v47  ;;  %v1403_v50 = vadd.f32 %v1402_v48, %v1362_v46  ;;  %v2117_v48 = vrot.slane %v2112_v44, %v2973_v39 }
 0x16d   :  { %v1404_v51 = vpop.f32.mrf.mxu0 }
 0x16e   :  { %vm1612_vm1 = vcmp.ge.f32.partialorder %v1442_v49, 0.0  ;;  %v1616_v52 = vmul.f32 0.2, %v1442_v49  ;;  %v1444_v54 = vadd.f32 %v1443_v10, %v1403_v50 }
 0x16f   :  { %v1405_v55 = vpop.f32.mrf.mxu0 }
 0x170   :  { %v1617_v56 = vmul.f32 0.2, %v1444_v54  ;;  %vm1613_vm2 = vcmp.ge.f32.partialorder %v1444_v54, 0.0  ;;  %v1620_v57 = vsel %vm1612_vm1, %v1442_v49, %v1616_v52  ;;  %v2121_v49 = vrot.slane %v2112_v44, %v2978_v41 }
 0x171   :  { %v1624_v62 = vpack.c.bf16 %v1620_v57, %v1620_v57 }
 0x172   :  { %v1482_v58 = vpop.f32.mrf.mxu1  ;;  %v1621_v59 = vsel %vm1613_vm2, %v1444_v54, %v1617_v56 }
 0x173   :  { %v1625_v61 = vpack.c.bf16 %v1621_v59, %v1621_v59  ;;  %v1483_v8 = vadd.f32 %v1482_v58, %v291_v4  ;;  %v2413_v58 = vld [vmem:[#allocation2] ss:$0 sm:$0xff] }
 0x174   :  { %v1484_v60 = vpop.f32.mrf.mxu1 }
 0x175   :  { %2056 = vmatprep.mubr.bf16.mxu0 %v1625_v61  ;;  %v1485_v12 = vadd.f32 %v1484_v60, %v295_v6 }
 0x176   :  { %v1486_v63 = vpop.f32.mrf.mxu1  ;;  %2057 = vmatmul.mubr.bf16.vlgmr.msra.gmra.mxu0 %v1624_v62 }
 0x178   :  { %v1487_v0 = vpop.f32.mrf.mxu1 }
 0x1a9   :  { %v1523_v3 = vpop.f32.mrf.mxu0 }
 0x1aa   :  { %v1524_v13 = vadd.f32 %v1523_v3, %v1483_v8 }
 0x1ab   :  { %v1525_v5 = vpop.f32.mrf.mxu0 }
 0x1ac   :  { %v1526_v16 = vadd.f32 %v1525_v5, %v1485_v12 }
 0x1ad   :  { %v1527_v7 = vpop.f32.mrf.mxu0 }
 0x1af   :  { %v1528_v11 = vpop.f32.mrf.mxu0 }
 0x1b1   :  { %v1605_v15 = vpop.f32.mrf.mxu0 }
 0x1b2   :  { %v1564_v14 = vpop.f32.mrf.mxu1 }
 0x1b3   :  { %v1565_v18 = vadd.f32 %v1564_v14, %v1524_v13  ;;  %v1607_v22 = vpop.f32.mrf.mxu0 }
 0x1b4   :  { %v1566_v19 = vpop.f32.mrf.mxu1 }
 0x1b5   :  { %v1606_v23 = vadd.f32 %v1605_v15, %v1565_v18  ;;  %v1567_v24 = vadd.f32 %v1566_v19, %v1526_v16  ;;  %v1609_v26 = vpop.f32.mrf.mxu0 }
 0x1b6   :  { %v1568_v25 = vpop.f32.mrf.mxu1 }
 0x1b7   :  { %vm1614_vm3 = vcmp.ge.f32.partialorder %v1606_v23, 0.0  ;;  %v1618_v27 = vmul.f32 0.2, %v1606_v23  ;;  %v1608_v28 = vadd.f32 %v1607_v22, %v1567_v24  ;;  %v1610_v30 = vpop.f32.mrf.mxu0 }
 0x1b8   :  { %v1569_v29 = vpop.f32.mrf.mxu1 }
 0x1b9   :  { %vm1615_vm4 = vcmp.ge.f32.partialorder %v1608_v28, 0.0  ;;  %v1619_v31 = vmul.f32 0.2, %v1608_v28  ;;  %v1622_v32 = vsel %vm1614_vm3, %v1606_v23, %v1618_v27 }
 0x1ba   :  { %v1626_v34 = vpack.c.bf16 %v1622_v32, %v1622_v32 }
 0x1bb   :  { %v1623_v33 = vsel %vm1615_vm4, %v1608_v28, %v1619_v31 }
 0x1bc   :  { %v1627_v10 = vpack.c.bf16 %v1623_v33, %v1623_v33 }
 0x1be   :  { %2097 = vmatprep.mubr.bf16.mxu1 %v1627_v10 }
 0x1bf   :  { %2098 = vmatmul.mubr.bf16.vlgmr.msra.gmra.mxu1 %v1626_v34 }
 0x236   :  { %v2058_v35 = vpop.f32.mrf.mxu0 }
 0x237   :  { %v2059_v40 = vadd.f32 %v2058_v35, %v1697_v21 }
 0x238   :  { %v2060_v36 = vpop.f32.mrf.mxu0 }
 0x239   :  { %v2061_v42 = vadd.f32 %v2060_v36, %v1701_v20 }
 0x23a   :  { %v2062_v17 = vpop.f32.mrf.mxu0 }
 0x23c   :  { %v2063_v38 = vpop.f32.mrf.mxu0 }
 0x27f   :  { %v2099_v9 = vpop.f32.mrf.mxu1 }
 0x280   :  { %v2100_v43 = vadd.f32 %v2099_v9, %v2059_v40 }
 0x281   :  { %v2101_v37 = vpop.f32.mrf.mxu1 }
 0x282   :  { %vm2106_vm5 = vcmp.ge.f32.partialorder %v2100_v43, 0.0  ;;  %v2108_v45 = vmul.f32 0.2, %v2100_v43  ;;  %v2102_v46 = vadd.f32 %v2101_v37, %v2061_v42 }
 0x283   :  { %v2103_v47 = vpop.f32.mrf.mxu1 }
 0x284   :  { %vm2107_vm6 = vcmp.ge.f32.partialorder %v2102_v46, 0.0  ;;  %v2109_v50 = vmul.f32 0.2, %v2102_v46  ;;  %v2110_v51 = vsel %vm2106_vm5, %v2100_v43, %v2108_v45 }
 0x285   :  { %v2104_v52 = vpop.f32.mrf.mxu1  ;;  %v2124_v55 = vmul.f32 %v2117_v48, %v2110_v51 }
 0x286   :  { %v2111_v54 = vsel %vm2107_vm6, %v2102_v46, %v2109_v50 }
 0x287   :  { %v2125_v56 = vmul.f32 %v2121_v49, %v2111_v54 }
 0x289   :  { %v2126_v57 = vadd.f32 %v2125_v56, %v2124_v55 }
 0x28b   :  { %2127 = vadd.xlane.f32.xlu0 %v2126_v57 }
 0x314   :  { %v2128_v59 = vpop.xlane.xlu0 %2127 }
 0x315   :  { %v2136_v60 = vadd.f32 %v2413_v58, %v2128_v59 }
 0x317   :  { %v2414_v61 = vmul.f32 -1.442695, %v2136_v60 }
 0x319   :  { %2813 = vpow2.f32 %v2414_v61 }
 0x326   :  { %v2814_v62 = vpop.eup %2813 }
 0x327   :  { %v2140_v63 = vadd.f32 1.0, %v2814_v62 }
 0x329   :  { %2815 = vrcp.f32 %v2140_v63 }
 0x336   :  { %v2816_v39 = vpop.eup %2815 }
 0x337   :  { %2144 = vst.msk [vmem:[%s3002_s7] sm:$0xff] %vm2143_vm7, %v2816_v39 }
 0x338   :  { %2149 = vsyncpa [#allocation4], 1 }
 0x339   :  { %2150 = vsyncpa [#allocation6], 1 }

</bundles_post_ra>
